<compile_context>
chip_gen: v7x
topology: tpu7x:2x2x1
jax: 0.10.0
libtpu: 0.0.40
codegen_flags: <defaults>
</compile_context>

<pallas_src>
import functools

import jax
import jax.numpy as jnp
from jax.experimental import pallas as pl
from jax.experimental.pallas import tpu as pltpu


def _round_up(x, m):
    return ((x + m - 1) // m) * m


def _vmem_capacity_bytes():
    """Physical VMEM per TensorCore; conservative (v7x-sized) fallback."""
    try:
        info = pltpu.get_tpu_info()
        cap = getattr(info, "vmem_capacity_bytes", None)
        if cap:
            return int(cap)
    except Exception:
        pass
    return 64 << 20


def _triplet_kernel(a_ref, p_ref, n_ref, out_ref, acc_ref, *, margin, batch,
                    tile_b, num_d, valid_cols, row_mask):
    """One (batch-tile, feature-tile) grid step.

    Fused per-row reduction sum((a-p)^2 - (a-n)^2) for this block, optionally
    accumulated across feature tiles in acc_ref; on the last feature step
    applies +margin / relu / row masking and stores the per-tile partial
    batch-sum into a lane-dense (1, 8, 128) output block.
    """
    i = pl.program_id(0)
    j = pl.program_id(1)

    # Upcast in-kernel; HBM traffic stays in the (possibly bf16) input dtype.
    a = a_ref[...].astype(jnp.float32)
    p = p_ref[...].astype(jnp.float32)
    n = n_ref[...].astype(jnp.float32)

    dp = a - p
    dn = a - n
    contrib = dp * dp - dn * dn                                 # (TB, TD) f32

    def reduce_full():
        return jnp.sum(contrib, axis=1, keepdims=True)           # (TB, 1)

    def reduce_col_masked():
        # Last (ragged) feature tile: zero lanes past D before reducing.
        col = jax.lax.broadcasted_iota(jnp.int32, contrib.shape, 1)
        return jnp.sum(jnp.where(col < valid_cols, contrib, 0.0),
                       axis=1, keepdims=True)

    def finalize(dist_diff):
        losses = jnp.maximum(dist_diff + margin, 0.0)            # (TB, 1)
        if row_mask:
            # Mask padded batch rows BEFORE the sum (handles OOB garbage/NaN).
            row = i * tile_b + jax.lax.broadcasted_iota(
                jnp.int32, losses.shape, 0)
            losses = jnp.where(row < batch, losses, 0.0)
        out_ref[...] = jnp.broadcast_to(jnp.sum(losses), out_ref.shape)

    if acc_ref is None:
        # Common case: the whole feature axis fits in one block.
        finalize(reduce_full())
    else:
        @pl.when(j == 0)
        def _():
            acc_ref[...] = jnp.zeros_like(acc_ref)

        if valid_cols is None:
            acc_ref[...] += reduce_full()
        else:
            @pl.when(j != num_d - 1)
            def _():
                acc_ref[...] += reduce_full()

            @pl.when(j == num_d - 1)
            def _():
                acc_ref[...] += reduce_col_masked()

        @pl.when(j == num_d - 1)
        def _():
            finalize(acc_ref[...])


def triplet_loss(anchor, positive, negative, margin, size_average=True, *,
                 batch_tile=None, feature_tile=None):
    """Pallas TPU implementation of TripletLoss.forward.

    anchor/positive/negative: (B, D) float arrays. Returns a float32 scalar:
    mean over batch if size_average else sum. batch_tile / feature_tile are
    optional tuning/testing overrides (None = auto).
    """
    assert anchor.shape == positive.shape == negative.shape
    assert anchor.ndim == 2
    B, D = anchor.shape
    dtype = anchor.dtype
    itemsize = jnp.dtype(dtype).itemsize

    # ---- generation-aware budgets ---------------------------------------
    vmem_cap = _vmem_capacity_bytes()
    small_vmem = vmem_cap <= (64 << 20)          # v7x-class chip
    vmem_budget = int(vmem_cap * 0.78)           # ~50 MiB v7x, ~100 MiB v5e/v6e
    target_in_tile = (5 << 20) if small_vmem else (4 << 20)   # per-input tile
    fixed_overhead = 2 << 20                     # sems, descriptors, misc
    temp_blocks = 4                              # in-kernel f32 temporaries
    pack = max(8, 32 // itemsize)                # sublane pack: 8/16/32 rows
    d_pad_full = _round_up(D, 128)               # lane-padded feature width

    def per_row_bytes(d_blk, n_buf):
        # 3 inputs x n_buf pipeline buffers (HBM dtype) + f32 temporaries
        # + the lane-padded f32 accumulator row.
        return d_blk * (3 * n_buf * itemsize + temp_blocks * 4) + 128 * 4

    # ---- feature (lane) tiling: only when one block can't double-buffer --
    if feature_tile is not None:
        tile_d = min(_round_up(int(feature_tile), 128), d_pad_full)
    else:
        min_rows = (vmem_budget - fixed_overhead) // per_row_bytes(d_pad_full, 2)
        if min_rows >= pack:
            tile_d = D
        else:
            # Very wide D: tile the feature axis in 128-lane multiples.
            cols = max(1, (vmem_budget - fixed_overhead)
                       // (pack * per_row_bytes(128, 2)))
            tile_d = min(cols * 128, d_pad_full)
    if tile_d >= D:
        tile_d = D
    feature_tiled = tile_d < D
    d_blk_pad = tile_d if feature_tiled else d_pad_full
    num_d = pl.cdiv(D, tile_d) if feature_tiled else 1

    # ---- batch (sublane) tiling ------------------------------------------
    if batch_tile is not None:
        tile_b = _round_up(max(int(batch_tile), 1), pack)
    else:
        by_budget = (vmem_budget - fixed_overhead) // per_row_bytes(d_blk_pad, 2)
        by_target = max(pack, target_in_tile // (d_blk_pad * itemsize))
        tile_b = max(pack, (min(by_budget, by_target) // pack) * pack)
    tile_b = max(pack, min(tile_b, _round_up(B, pack)))

    # v7x has 2 TensorCores: make sure the "parallel" batch axis has >= 2
    # steps to shard whenever the batch is big enough to split.
    if small_vmem and batch_tile is None and B > pack and pl.cdiv(B, tile_b) < 2:
        tile_b = _round_up(pl.cdiv(B, 2), pack)

    num_b = pl.cdiv(B, tile_b)
    needs_row_mask = (B % tile_b) != 0
    valid_cols = (D - (num_d - 1) * tile_d) \
        if (feature_tiled and D % tile_d != 0) else None

    # ---- optional deeper input pipeline (near-free when VMEM allows) -----
    n_buf = 2
    footprint3 = fixed_overhead + tile_b * per_row_bytes(d_blk_pad, 3)
    if num_b * num_d >= 3 and footprint3 <= vmem_budget:
        n_buf = 3

    def make_in_spec():
        idx = lambda i, j: (i, j)
        if n_buf > 2:
            try:
                return pl.BlockSpec((tile_b, tile_d), idx,
                                    pipeline_mode=pl.Buffered(n_buf))
            except Exception:  # older jax without pipeline_mode / Buffered
                pass
        return pl.BlockSpec((tile_b, tile_d), idx)

    in_spec = make_in_spec()

    kern = functools.partial(
        _triplet_kernel, margin=float(margin), batch=B, tile_b=tile_b,
        num_d=num_d, valid_cols=valid_cols, row_mask=needs_row_mask)
    if feature_tiled:
        kernel = kern
        scratch = [pltpu.VMEM((tile_b, 1), jnp.float32)]
    else:
        kernel = lambda a_r, p_r, n_r, o_r: kern(a_r, p_r, n_r, o_r, None)
        scratch = []

    partials = pl.pallas_call(
        kernel,
        out_shape=jax.ShapeDtypeStruct((num_b, 8, 128), jnp.float32),
        grid=(num_b, num_d),
        in_specs=[in_spec, in_spec, in_spec],
        out_specs=pl.BlockSpec((1, 8, 128), lambda i, j: (i, 0, 0)),
        scratch_shapes=scratch,
        compiler_params=pltpu.CompilerParams(
            dimension_semantics=("parallel", "arbitrary"),
            vmem_limit_bytes=int(vmem_budget),
        ),
        cost_estimate=pl.CostEstimate(
            flops=6 * B * D,
            transcendentals=0,
            bytes_accessed=int(3 * B * D * itemsize + num_b * 8 * 128 * 4),
        ),
    )(anchor, positive, negative)

    total = jnp.sum(partials[:, 0, 0])
    return total / B if size_average else total


def _reference(anchor, positive, negative, margin, size_average):
    a = anchor.astype(jnp.float32)
    p = positive.astype(jnp.float32)
    n = negative.astype(jnp.float32)
    dpos = jnp.sum((a - p) ** 2, axis=1)
    dneg = jnp.sum((a - n) ** 2, axis=1)
    losses = jnp.maximum(dpos - dneg + margin, 0.0)
    return jnp.mean(losses) if size_average else jnp.sum(losses)


if __name__ == "__main__":
    keys = jax.random.split(jax.random.PRNGKey(0), 9)

    # Test 1: small shapes consistent with the module (f32), mean + sum.
    B, D, margin = 8, 32, 1.0
    a = jax.random.normal(keys[0], (B, D), dtype=jnp.float32)
    p = jax.random.normal(keys[1], (B, D), dtype=jnp.float32)
    n = jax.random.normal(keys[2], (B, D), dtype=jnp.float32)
    out_mean = jax.block_until_ready(triplet_loss(a, p, n, margin, True))
    out_sum = jax.block_until_ready(triplet_loss(a, p, n, margin, False))
    assert jnp.allclose(out_mean, _reference(a, p, n, margin, True),
                        rtol=1e-5, atol=1e-5), out_mean
    assert jnp.allclose(out_sum, _reference(a, p, n, margin, False),
                        rtol=1e-5, atol=1e-5), out_sum

    # Test 2: ragged batch, multi-step "parallel" axis (+ Buffered(3) path).
    B, D, margin = 100, 256, 0.5
    a = jax.random.normal(keys[3], (B, D), dtype=jnp.float32)
    p = jax.random.normal(keys[4], (B, D), dtype=jnp.float32)
    n = jax.random.normal(keys[5], (B, D), dtype=jnp.float32)
    out = jax.block_until_ready(
        triplet_loss(a, p, n, margin, True, batch_tile=32))
    assert jnp.allclose(out, _reference(a, p, n, margin, True),
                        rtol=1e-5, atol=1e-5), out

    # Test 3: bf16 inputs + forced feature-axis tiling (wide-D robustness path,
    # ragged rows and ragged last feature tile).
    B, D, margin = 60, 320, 1.0
    a = jax.random.normal(keys[6], (B, D), dtype=jnp.bfloat16)
    p = jax.random.normal(keys[7], (B, D), dtype=jnp.bfloat16)
    n = jax.random.normal(keys[8], (B, D), dtype=jnp.bfloat16)
    out = jax.block_until_ready(
        triplet_loss(a, p, n, margin, True, feature_tile=128))
    assert jnp.allclose(out, _reference(a, p, n, margin, True),
                        rtol=2e-3, atol=2e-3), out

    print("KERNEL_OK")
</pallas_src>

<mosaic_0001>
module attributes {stable_mosaic.version = 11 : i64} {
  func.func @_lambda_(%arg0: i32, %arg1: i32, %arg2: memref<8x32xf32, #tpu.memory_space<vmem>>, %arg3: memref<8x32xf32, #tpu.memory_space<vmem>>, %arg4: memref<8x32xf32, #tpu.memory_space<vmem>>, %arg5: memref<1x8x128xf32, #tpu.memory_space<vmem>>) attributes {dimension_semantics = [#tpu.dimension_semantics<parallel>, #tpu.dimension_semantics<arbitrary>], iteration_bounds = array<i64: 1, 1>, scalar_prefetch = 0 : i64, scratch_operands = 0 : i64, tpu.core_type = #tpu.core_type<tc>, window_params = [{transform_indices = @transform_0, window_bounds = array<i64: 8, 32>}, {transform_indices = @transform_1, window_bounds = array<i64: 8, 32>}, {transform_indices = @transform_2, window_bounds = array<i64: 8, 32>}, {transform_indices = @transform_3, window_bounds = array<i64: 1, 8, 128>}]} {
    %c0 = arith.constant 0 : index
    %c0_0 = arith.constant 0 : index
    %0 = vector.load %arg2[%c0, %c0_0] : memref<8x32xf32, #tpu.memory_space<vmem>>, vector<8x32xf32>
    %c0_1 = arith.constant 0 : index
    %c0_2 = arith.constant 0 : index
    %1 = vector.load %arg3[%c0_1, %c0_2] : memref<8x32xf32, #tpu.memory_space<vmem>>, vector<8x32xf32>
    %c0_3 = arith.constant 0 : index
    %c0_4 = arith.constant 0 : index
    %2 = vector.load %arg4[%c0_3, %c0_4] : memref<8x32xf32, #tpu.memory_space<vmem>>, vector<8x32xf32>
    %3 = arith.subf %0, %1 : vector<8x32xf32>
    %4 = arith.subf %0, %2 : vector<8x32xf32>
    %5 = arith.mulf %3, %3 : vector<8x32xf32>
    %6 = arith.mulf %4, %4 : vector<8x32xf32>
    %7 = arith.subf %5, %6 : vector<8x32xf32>
    %cst = arith.constant dense<0.000000e+00> : vector<8xf32>
    %8 = vector.multi_reduction <add>, %7, %cst [1] : vector<8x32xf32> to vector<8xf32>
    %9 = vector.shape_cast %8 : vector<8xf32> to vector<8x1xf32>
    %cst_5 = arith.constant 1.000000e+00 : f32
    %10 = vector.broadcast %cst_5 : f32 to vector<8x1xf32>
    %11 = arith.addf %9, %10 : vector<8x1xf32>
    %cst_6 = arith.constant 0.000000e+00 : f32
    %12 = vector.broadcast %cst_6 : f32 to vector<8x1xf32>
    %13 = arith.maximumf %11, %12 : vector<8x1xf32>
    %14 = vector.shape_cast %13 : vector<8x1xf32> to vector<1x8x1xf32>
    %cst_7 = arith.constant dense<0.000000e+00> : vector<1xf32>
    %15 = vector.multi_reduction <add>, %14, %cst_7 [1, 2] : vector<1x8x1xf32> to vector<1xf32>
    %16 = vector.shape_cast %15 : vector<1xf32> to vector<1x1x1xf32>
    %17 = vector.extract %16[0, 0, 0] : f32 from vector<1x1x1xf32>
    %18 = vector.broadcast %17 : f32 to vector<1x8x128xf32>
    %c0_8 = arith.constant 0 : index
    %c0_9 = arith.constant 0 : index
    %c0_10 = arith.constant 0 : index
    %19 = vector.load %arg5[%c0_8, %c0_9, %c0_10] : memref<1x8x128xf32, #tpu.memory_space<vmem>>, vector<1x8x128xf32>
    tpu.vector_store %arg5[%c0_8, %c0_9, %c0_10], %18 {strides = array<i32>} : memref<1x8x128xf32, #tpu.memory_space<vmem>>, vector<1x8x128xf32>,
    return
  }
  func.func @transform_0(%arg0: i32, %arg1: i32) -> (i32, i32) {
    %c0_i32 = arith.constant 0 : i32
    return %arg0, %arg1 : i32, i32
  }
  func.func @transform_1(%arg0: i32, %arg1: i32) -> (i32, i32) {
    %c0_i32 = arith.constant 0 : i32
    return %arg0, %arg1 : i32, i32
  }
  func.func @transform_2(%arg0: i32, %arg1: i32) -> (i32, i32) {
    %c0_i32 = arith.constant 0 : i32
    return %arg0, %arg1 : i32, i32
  }
  func.func @transform_3(%arg0: i32, %arg1: i32) -> (i32, i32, i32) {
    %c0_i32 = arith.constant 0 : i32
    %c0_i32_0 = arith.constant 0 : i32
    %c0_i32_1 = arith.constant 0 : i32
    return %arg0, %c0_i32, %c0_i32_0 : i32, i32, i32
  }
}

</mosaic_0001>

<bundles_post_ra>
// kernel: tpu_custom_call.1
= control target key start
LH: loop header
LB: loop body
LE: loop exit
PB: predicated region body
PF: predicated region fallthrough
CT: control target
= control target key end

     0   :  { %8 = vsyncpa [#allocation3], 0  ;;  %s265_s0 = inlined_call_operand.hbm [shape: f32[8,32], index: 0, kind: input, shape index: {}]   ;;  %s266_s1 = inlined_call_operand.hbm [shape: f32[8,32], index: 1, kind: input, shape index: {}]   ;;  %s267_s2 = inlined_call_operand.hbm [shape: f32[8,32], index: 2, kind: input, shape index: {}]   ;;  %s268_s3 = inlined_call_operand.hbm [shape: f32[1,8,128], index: 3, kind: output, shape index: {}]  }
   0x1   :  { %9 = vsyncpa [#allocation6], 0 }
   0x2   :  { %10 = vsyncpa [#allocation4], 0  ;;  %s193_s12 = smov [#allocation5]   ;;  %s194_s14 = smov [#allocation2]  }
   0x3   :  { %s27_s13 = sshll.u32 %s193_s12, 4  ;;  %s17_s15 = sshll.u32 %s194_s14, 4  ;;  %s28_s13 = int_to_ptr.vmem [resolvable:$true] %s27_s13  ;;  %s18_s15 = int_to_ptr.vmem [resolvable:$true] %s17_s15 }
   0x4   :  { %s99_s18 = scalar_lea.hbm %s266_s1, 128 }
   0x5   :  { %p100_p0 = scmp.ne.s32.totalorder %s266_s1, %s99_s18  ;;  %p103_p1 = scmp.lt.u32.totalorder %s99_s18, %s266_s1 }
   0x7   :  { %p105_p2 = pnand %p103_p1, %p100_p0 }
   0x9   :  { %108 = shalt.err (!%p105_p2)
}
   0xa   :  { %s109_s23 = scalar_lea.vmem %s28_s13, 128  ;;  %p114_p4 = scmp.lt.s32.totalorder %s28_s13, %s28_s13 }
   0xb   :  { %p110_p3 = scmp.ne.s32.totalorder %s28_s13, %s109_s23  ;;  %p115_p5 = scmp.lt.s32.totalorder %s109_s23, %s109_s23 }
   0xd   :  { %p116_p6 = por %p115_p5, %p114_p4 }
   0xf   :  { %p117_p7 = pnand %p116_p6, %p110_p3 }
  0x11   :  { %120 = shalt.err (!%p117_p7)
}
  0x12   :  { %30 = dma.hbm_to_vmem [thread:$0]  %s266_s1, 128, %s28_s13, [#allocation6]  }
  0x13   :  { %s121_s28 = scalar_lea.hbm %s265_s0, 128 }
  0x14   :  { %p122_p8 = scmp.ne.s32.totalorder %s265_s0, %s121_s28  ;;  %p125_p9 = scmp.lt.u32.totalorder %s121_s28, %s265_s0 }
  0x16   :  { %p127_p10 = pnand %p125_p9, %p122_p8 }
  0x18   :  { %130 = shalt.err (!%p127_p10)
}
  0x19   :  { %s131_s6 = scalar_lea.vmem %s18_s15, 128  ;;  %p136_p12 = scmp.lt.s32.totalorder %s18_s15, %s18_s15 }
  0x1a   :  { %p132_p11 = scmp.ne.s32.totalorder %s18_s15, %s131_s6  ;;  %p137_p13 = scmp.lt.s32.totalorder %s131_s6, %s131_s6 }
  0x1c   :  { %p138_p0 = por %p137_p13, %p136_p12 }
  0x1e   :  { %p139_p1 = pnand %p138_p0, %p132_p11 }
  0x20   :  { %142 = shalt.err (!%p139_p1)
}
  0x21   :  { %20 = dma.hbm_to_vmem [thread:$0]  %s265_s0, 128, %s18_s15, [#allocation3]  }
  0x22   :  { %s195_s8 = smov [#allocation7]   ;;  %s143_s12 = scalar_lea.hbm %s267_s2, 128 }
  0x23   :  { %s37_s9 = sshll.u32 %s195_s8, 4  ;;  %p144_p2 = scmp.ne.s32.totalorder %s267_s2, %s143_s12  ;;  %s38_s9 = int_to_ptr.vmem [resolvable:$true] %s37_s9 }
  0x24   :  { %p147_p3 = scmp.lt.u32.totalorder %s143_s12, %s267_s2 }
  0x26   :  { %p149_p4 = pnand %p147_p3, %p144_p2 }
  0x28   :  { %152 = shalt.err (!%p149_p4)
}
  0x29   :  { %s153_s18 = scalar_lea.vmem %s38_s9, 128  ;;  %p158_p6 = scmp.lt.s32.totalorder %s38_s9, %s38_s9 }
  0x2a   :  { %p154_p5 = scmp.ne.s32.totalorder %s38_s9, %s153_s18  ;;  %p159_p7 = scmp.lt.s32.totalorder %s153_s18, %s153_s18 }
  0x2c   :  { %p160_p8 = por %p159_p7, %p158_p6 }
  0x2e   :  { %p161_p9 = pnand %p160_p8, %p154_p5 }
  0x30   :  { %164 = shalt.err (!%p161_p9)
}
  0x31   :  { %40 = dma.hbm_to_vmem [thread:$0]  %s267_s2, 128, %s38_s9, [#allocation6]  }
  0x32   :  { %187 = dma.done.wait [#allocation3], 128  }
  0x33   :  { %188 = vsyncadd [#allocation3], 4294967168 }
  0x34   :  { %189 = dma.done.wait [#allocation6], 256  }
  0x35   :  { %190 = vsyncadd [#allocation6], 4294967040  ;;  %v50_v0 = vld [vmem:[#allocation2] sm:$0xff]  ;;  %v51_v1 = vld [vmem:[#allocation5] sm:$0xff]  ;;  %vm58_vm0 = vcmask 261120   ;;  %vm64_vm1 = vcmask 7168  }
  0x36   :  { %v52_v2 = vld [vmem:[#allocation7] sm:$0xff]  ;;  %v53_v3 = vsub.f32 %v50_v0, %v51_v1  ;;  %s196_s2 = smov [#allocation8]  }
  0x37   :  { %v54_v4 = vsub.f32 %v50_v0, %v52_v2  ;;  %s83_s19 = sshll.u32 %s196_s2, 4  ;;  %s84_s19 = int_to_ptr.vmem [resolvable:$true] %s83_s19 }
  0x38   :  { %v55_v5 = vmul.f32 %v53_v3, %v53_v3  ;;  %s165_s21 = scalar_lea.vmem %s84_s19, 128  ;;  %p170_p11 = scmp.lt.s32.totalorder %s84_s19, %s84_s19 }
  0x39   :  { %v56_v6 = vmul.f32 %v54_v4, %v54_v4  ;;  %p166_p10 = scmp.ne.s32.totalorder %s84_s19, %s165_s21  ;;  %p171_p12 = scmp.lt.s32.totalorder %s165_s21, %s165_s21 }
  0x3b   :  { %v57_v7 = vsub.f32 %v55_v5, %v56_v6  ;;  %p172_p13 = por %p171_p12, %p170_p11 }
  0x3d   :  { %v59_v8 = vsel %vm58_vm0, %v57_v7, 0.0  ;;  %p173_p0 = pnand %p172_p13, %p166_p10 }
  0x3e   :  { %60 = vadd.xlane.f32.xlu0 %v59_v8 }
  0xcb   :  { %v61_v9 = vpop.xlane.xlu0 %60 }
  0xcc   :  { %v62_v10 = vadd.f32 1.0, %v61_v9 }
  0xce   :  { %v63_v11 = vmax.f32 %v62_v10, 0.0 }
  0xd0   :  { %v65_v12 = vsel %vm64_vm1, %v63_v11, 0.0 }
  0xd1   :  { %66 = vadd.xlane.f32.xlu0 %v65_v12 }
 0x15e   :  { %v67_v13 = vpop.xlane.xlu0 %66 }
 0x15f   :  { %v68_v14 = vrot.slane %v67_v13, 4 }
 0x161   :  { %v69_v15 = vadd.f32 %v68_v14, %v67_v13 }
 0x163   :  { %v70_v16 = vrot.slane %v69_v15, 2 }
 0x165   :  { %v71_v17 = vadd.f32 %v70_v16, %v69_v15 }
 0x167   :  { %v72_v18 = vrot.slane %v71_v17, 1 }
 0x169   :  { %v73_v19 = vadd.f32 %v72_v18, %v71_v17 }
 0x16b   :  { %93 = vpush %v73_v19 }
 0x19c   :  { %s94_s20 = spop %93 }
 0x19d   :  { %v75_v20 = vstv %s94_s20 }
 0x19e   :  { %76 = vst [vmem:[#allocation8] sm:$0xff] %v75_v20 }
 0x19f   :  { %176 = shalt.err (!%p173_p0)
}
 0x1a0   :  { %s177_s24 = scalar_lea.hbm %s268_s3, 128 }
 0x1a1   :  { %p178_p1 = scmp.ne.s32.totalorder %s268_s3, %s177_s24  ;;  %p181_p2 = scmp.lt.u32.totalorder %s177_s24, %s268_s3 }
 0x1a3   :  { %p183_p3 = pnand %p181_p2, %p178_p1 }
 0x1a5   :  { %186 = shalt.err (!%p183_p3)
}
 0x1a6   :  { %86 = dma.vmem_to_hbm [thread:$0]  %s84_s19, 128, %s268_s3, [#allocation4]  }
 0x1a7   :  { %191 = dma.done.wait [#allocation4], 128  }
 0x1a8   :  { %192 = vsyncadd [#allocation4], 4294967168 }
 0x1a9   :  { %90 = vsyncpa [#allocation3], 1 }
 0x1aa   :  { %91 = vsyncpa [#allocation6], 1 }
 0x1ab   :  { %92 = vsyncpa [#allocation4], 1 }

</bundles_post_ra>
